<compile_context>
chip_gen: v7x
topology: tpu7x:2x2x1
jax: 0.10.0
libtpu: 0.0.40
codegen_flags: <defaults>
</compile_context>

<pallas_src>
import functools

import jax
import jax.numpy as jnp
from jax.experimental import pallas as pl
from jax.experimental.pallas import tpu as pltpu

LANES = 128


def _round_up(a, b):
    return ((a + b - 1) // b) * b


def _sublane_multiple(dtype):
    # sublane packing multiple per element width (f32:8, bf16:16, int8/bool:32)
    return {4: 8, 2: 16, 1: 32}.get(jnp.dtype(dtype).itemsize, 8)


def _focal_loss_kernel(x_ref, t_ref, out_ref, *, gamma, n_valid, num_blocks,
                       block_elems):
    i = pl.program_id(0)

    x = x_ref[...].astype(jnp.float32)
    t = t_ref[...].astype(jnp.float32)

    # loss = x - x*t + softplus(-x)
    # stable softplus(-x) = max(-x, 0) + log(1 + exp(-|x|))   [1 exp + 1 log]
    e_x = jnp.exp(-jnp.abs(x))
    loss = x - x * t + jnp.maximum(-x, 0.0) + jnp.log(1.0 + e_x)

    # modulating factor = exp(gamma * logsigmoid(z)) = sigmoid(z)**gamma,
    # z = -x*(2t-1)
    z = x * (1.0 - 2.0 * t)
    e_z = jnp.exp(-jnp.abs(z))                                  # 1 exp
    if float(gamma).is_integer() and 0.0 <= gamma <= 8.0:
        # stable sigmoid(z), then a few pure-VPU multiplies for the power.
        sig = jnp.where(z >= 0.0, 1.0, e_z) / (1.0 + e_z)
        w = jnp.ones_like(sig)
        for _ in range(int(gamma)):
            w = w * sig
    else:
        # general (non-integer) gamma: exp(gamma * logsigmoid(z))
        invprobs = jnp.minimum(z, 0.0) - jnp.log(1.0 + e_z)
        w = jnp.exp(invprobs * gamma)
    loss = w * loss

    def partial_sum(v):
        # (tile_rows, 128) -> (tile_rows//8, 8, 128); axis-0 sum = vreg adds.
        return v.reshape(v.shape[0] // 8, 8, LANES).sum(axis=0)

    out_ref[...] = partial_sum(loss)

    # Ragged last block: padded / OOB-garbage elements must not reach the sum.
    tail_valid = n_valid - (num_blocks - 1) * block_elems  # static Python int
    if tail_valid < block_elems:                           # static: only emit if needed
        @pl.when(i == num_blocks - 1)
        def _():
            rows = jax.lax.broadcasted_iota(jnp.int32, loss.shape, 0)
            cols = jax.lax.broadcasted_iota(jnp.int32, loss.shape, 1)
            flat = rows * LANES + cols          # local index within this block
            masked = jnp.where(flat < tail_valid, loss, 0.0)
            out_ref[...] = partial_sum(masked)


def focal_loss(inputs, targets, gamma=2.0, max_tile_rows=1024):
    if inputs.shape != targets.shape:
        raise ValueError(
            "Target size ({}) must be the same as input size ({})".format(
                targets.shape, inputs.shape))

    n_valid = int(inputs.size)
    x = inputs.reshape(-1)    # metadata-only for contiguous arrays (no copy)
    t = targets.reshape(-1)

    # Pad (a copy) only when flat length is not a multiple of 128.
    rem = n_valid % LANES
    if rem:
        pad = LANES - rem
        x = jnp.pad(x, (0, pad))
        t = jnp.pad(t, (0, pad))

    rows = x.shape[0] // LANES
    x2 = x.reshape(rows, LANES)
    t2 = t.reshape(rows, LANES)

    # Row tile: as large as allowed (default 1024 rows = 512 KiB per f32 block,
    # ~2 MiB double-buffered VMEM), rounded for the narrowest input dtype.
    mult = max(_sublane_multiple(x2.dtype), _sublane_multiple(t2.dtype), 8)
    tile_rows = min(int(max_tile_rows), _round_up(rows, mult))
    tile_rows = _round_up(tile_rows, mult)

    num_blocks = int(pl.cdiv(rows, tile_rows))
    block_elems = tile_rows * LANES

    kernel = functools.partial(
        _focal_loss_kernel, gamma=float(gamma), n_valid=n_valid,
        num_blocks=num_blocks, block_elems=block_elems)

    partials = pl.pallas_call(
        kernel,
        out_shape=jax.ShapeDtypeStruct((num_blocks, 8, LANES), jnp.float32),
        grid_spec=pltpu.PrefetchScalarGridSpec(
            num_scalar_prefetch=0,
            grid=(num_blocks,),
            in_specs=[
                pl.BlockSpec((tile_rows, LANES), lambda i: (i, 0)),
                pl.BlockSpec((tile_rows, LANES), lambda i: (i, 0)),
            ],
            # Each block writes its own (8,128) lane-dense partial sum.
            out_specs=pl.BlockSpec((None, 8, LANES), lambda i: (i, 0, 0)),
        ),
        compiler_params=pltpu.CompilerParams(
            dimension_semantics=("parallel",)),
    )(x2, t2)

    # Tiny final reduction + mean outside the kernel.
    return jnp.sum(partials) / jnp.float32(n_valid)


def _focal_loss_ref(x, t, gamma=2.0):
    # Direct translation of the PyTorch module (reference only).
    x = x.astype(jnp.float32)
    t = t.astype(jnp.float32)
    max_val = jnp.maximum(-x, 0.0)
    loss = x - x * t + max_val + jnp.log(jnp.exp(-max_val) + jnp.exp(-x - max_val))
    invprobs = jax.nn.log_sigmoid(-x * (t * 2.0 - 1.0))
    loss = jnp.exp(invprobs * gamma) * loss
    return jnp.mean(loss)


if __name__ == "__main__":
    key = jax.random.PRNGKey(0)
    k1, k2, k3, k4 = jax.random.split(key, 4)

    # Segmentation-style NCHW logits / binary masks.
    B, C, H, W = 2, 4, 16, 16
    logits = jax.random.normal(k1, (B, C, H, W), dtype=jnp.float32) * 2.0
    target = (jax.random.uniform(k2, (B, C, H, W)) > 0.5).astype(jnp.float32)

    loss = focal_loss(logits, target, gamma=2.0)
    jax.block_until_ready(loss)
    ref = _focal_loss_ref(logits, target, gamma=2.0)
    assert jnp.allclose(loss, ref, rtol=1e-5, atol=1e-5), (loss, ref)

    # Ragged shape (exercises padding + last-block mask path).
    logits2 = jax.random.normal(k3, (3, 1, 7, 11), dtype=jnp.float32) * 2.0
    target2 = (jax.random.uniform(k4, (3, 1, 7, 11)) > 0.5).astype(jnp.float32)
    loss2 = focal_loss(logits2, target2, gamma=2.0)
    jax.block_until_ready(loss2)
    ref2 = _focal_loss_ref(logits2, target2, gamma=2.0)
    assert jnp.allclose(loss2, ref2, rtol=1e-5, atol=1e-5), (loss2, ref2)

    print("KERNEL_OK")
</pallas_src>

<mosaic_0001>
module attributes {stable_mosaic.version = 11 : i64} {
  func.func @_focal_loss_kernel(%arg0: i32, %arg1: memref<16x128xf32, #tpu.memory_space<vmem>>, %arg2: memref<16x128xf32, #tpu.memory_space<vmem>>, %arg3: memref<1x8x128xf32, #tpu.memory_space<vmem>>) attributes {dimension_semantics = [#tpu.dimension_semantics<parallel>], iteration_bounds = array<i64: 1>, scalar_prefetch = 0 : i64, scratch_operands = 0 : i64, tpu.core_type = #tpu.core_type<tc>, window_params = [{transform_indices = @transform_0, window_bounds = array<i64: 16, 128>}, {transform_indices = @transform_1, window_bounds = array<i64: 16, 128>}, {transform_indices = @transform_2, window_bounds = array<i64: 1, 8, 128>}]} {
    %c0 = arith.constant 0 : index
    %c0_0 = arith.constant 0 : index
    %0 = vector.load %arg1[%c0, %c0_0] : memref<16x128xf32, #tpu.memory_space<vmem>>, vector<16x128xf32>
    %c0_1 = arith.constant 0 : index
    %c0_2 = arith.constant 0 : index
    %1 = vector.load %arg2[%c0_1, %c0_2] : memref<16x128xf32, #tpu.memory_space<vmem>>, vector<16x128xf32>
    %2 = math.absf %0 : vector<16x128xf32>
    %cst = arith.constant 0.000000e+00 : f32
    %3 = vector.broadcast %cst : f32 to vector<16x128xf32>
    %4 = arith.subf %3, %2 : vector<16x128xf32>
    %5 = math.exp %4 : vector<16x128xf32>
    %6 = arith.mulf %0, %1 : vector<16x128xf32>
    %7 = arith.subf %0, %6 : vector<16x128xf32>
    %cst_3 = arith.constant 0.000000e+00 : f32
    %8 = vector.broadcast %cst_3 : f32 to vector<16x128xf32>
    %9 = arith.subf %8, %0 : vector<16x128xf32>
    %cst_4 = arith.constant 0.000000e+00 : f32
    %10 = vector.broadcast %cst_4 : f32 to vector<16x128xf32>
    %11 = arith.maximumf %9, %10 : vector<16x128xf32>
    %12 = arith.addf %7, %11 : vector<16x128xf32>
    %cst_5 = arith.constant 1.000000e+00 : f32
    %13 = vector.broadcast %cst_5 : f32 to vector<16x128xf32>
    %14 = arith.addf %13, %5 : vector<16x128xf32>
    %15 = math.log %14 : vector<16x128xf32>
    %16 = arith.addf %12, %15 : vector<16x128xf32>
    %cst_6 = arith.constant 2.000000e+00 : f32
    %17 = vector.broadcast %cst_6 : f32 to vector<16x128xf32>
    %18 = arith.mulf %17, %1 : vector<16x128xf32>
    %cst_7 = arith.constant 1.000000e+00 : f32
    %19 = vector.broadcast %cst_7 : f32 to vector<16x128xf32>
    %20 = arith.subf %19, %18 : vector<16x128xf32>
    %21 = arith.mulf %0, %20 : vector<16x128xf32>
    %22 = math.absf %21 : vector<16x128xf32>
    %cst_8 = arith.constant 0.000000e+00 : f32
    %23 = vector.broadcast %cst_8 : f32 to vector<16x128xf32>
    %24 = arith.subf %23, %22 : vector<16x128xf32>
    %25 = math.exp %24 : vector<16x128xf32>
    %cst_9 = arith.constant 0.000000e+00 : f32
    %26 = vector.broadcast %cst_9 : f32 to vector<16x128xf32>
    %27 = arith.cmpf oge, %21, %26 : vector<16x128xf32>
    %cst_10 = arith.constant 1.000000e+00 : f32
    %28 = vector.broadcast %cst_10 : f32 to vector<16x128xf32>
    %29 = arith.select %27, %28, %25 : vector<16x128xi1>, vector<16x128xf32>
    %cst_11 = arith.constant 1.000000e+00 : f32
    %30 = vector.broadcast %cst_11 : f32 to vector<16x128xf32>
    %31 = arith.addf %30, %25 : vector<16x128xf32>
    %32 = arith.divf %29, %31 : vector<16x128xf32>
    %cst_12 = arith.constant 1.000000e+00 : f32
    %33 = vector.broadcast %cst_12 : f32 to vector<16x128xf32>
    %34 = arith.mulf %33, %32 : vector<16x128xf32>
    %35 = arith.mulf %34, %32 : vector<16x128xf32>
    %36 = arith.mulf %35, %16 : vector<16x128xf32>
    %37 = vector.shape_cast %36 : vector<16x128xf32> to vector<2x8x128xf32>
    %cst_13 = arith.constant dense<0.000000e+00> : vector<8x128xf32>
    %38 = vector.multi_reduction <add>, %37, %cst_13 [0] : vector<2x8x128xf32> to vector<8x128xf32>
    %c0_14 = arith.constant 0 : index
    %c0_15 = arith.constant 0 : index
    %c0_16 = arith.constant 0 : index
    %39 = vector.load %arg3[%c0_14, %c0_15, %c0_16] : memref<1x8x128xf32, #tpu.memory_space<vmem>>, vector<1x8x128xf32>
    %40 = vector.shape_cast %39 : vector<1x8x128xf32> to vector<8x128xf32>
    %41 = vector.shape_cast %38 : vector<8x128xf32> to vector<1x8x128xf32>
    tpu.vector_store %arg3[%c0_14, %c0_15, %c0_16], %41 {strides = array<i32>} : memref<1x8x128xf32, #tpu.memory_space<vmem>>, vector<1x8x128xf32>,
    return
  }
  func.func @transform_0(%arg0: i32) -> (i32, i32) {
    %c0_i32 = arith.constant 0 : i32
    %c0_i32_0 = arith.constant 0 : i32
    return %arg0, %c0_i32 : i32, i32
  }
  func.func @transform_1(%arg0: i32) -> (i32, i32) {
    %c0_i32 = arith.constant 0 : i32
    %c0_i32_0 = arith.constant 0 : i32
    return %arg0, %c0_i32 : i32, i32
  }
  func.func @transform_2(%arg0: i32) -> (i32, i32, i32) {
    %c0_i32 = arith.constant 0 : i32
    %c0_i32_0 = arith.constant 0 : i32
    %c0_i32_1 = arith.constant 0 : i32
    return %arg0, %c0_i32, %c0_i32_0 : i32, i32, i32
  }
}

</mosaic_0001>

<bundles_post_ra>
// kernel: tpu_custom_call.1
= control target key start
LH: loop header
LB: loop body
LE: loop exit
PB: predicated region body
PF: predicated region fallthrough
CT: control target
= control target key end

     0   :  { %7 = vsyncpa [#allocation3], 0  ;;  %s265_s0 = inlined_call_operand.hbm [shape: f32[16,128], index: 0, kind: input, shape index: {}]   ;;  %s266_s1 = inlined_call_operand.hbm [shape: f32[16,128], index: 1, kind: input, shape index: {}]   ;;  %s267_s2 = inlined_call_operand.hbm [shape: f32[1,8,128], index: 2, kind: output, shape index: {}]  }
   0x1   :  { %8 = vsyncpa [#allocation6], 0 }
   0x2   :  { %9 = vsyncpa [#allocation4], 0  ;;  %s209_s9 = smov [#allocation2]   ;;  %s137_s13 = scalar_lea.hbm %s265_s0, 256 }
   0x3   :  { %s15_s10 = sshll.u32 %s209_s9, 4  ;;  %p138_p0 = scmp.ne.s32.totalorder %s265_s0, %s137_s13  ;;  %s16_s10 = int_to_ptr.vmem [resolvable:$true] %s15_s10 }
   0x4   :  { %p141_p1 = scmp.lt.u32.totalorder %s137_s13, %s265_s0 }
   0x6   :  { %p143_p2 = pnand %p141_p1, %p138_p0 }
   0x8   :  { %146 = shalt.err (!%p143_p2)
}
   0x9   :  { %s147_s18 = scalar_lea.vmem %s16_s10, 256  ;;  %p152_p4 = scmp.lt.s32.totalorder %s16_s10, %s16_s10 }
   0xa   :  { %p148_p3 = scmp.ne.s32.totalorder %s16_s10, %s147_s18  ;;  %p153_p5 = scmp.lt.s32.totalorder %s147_s18, %s147_s18 }
   0xc   :  { %p154_p6 = por %p153_p5, %p152_p4 }
   0xe   :  { %p155_p7 = pnand %p154_p6, %p148_p3 }
  0x10   :  { %158 = shalt.err (!%p155_p7)
}
  0x11   :  { %s210_s19 = smov 128   ;;  %s211_s20 = smov 8  }
  0x12   :  { %21 = dma.hbm_to_vmem [thread:$0]  %s265_s0, 256, %s16_s10, [#allocation3], %s210_s19, %s210_s19, %s211_s20  }
  0x13   :  { %s212_s23 = smov [#allocation5]   ;;  %s159_s27 = scalar_lea.hbm %s266_s1, 256 }
  0x14   :  { %s27_s24 = sshll.u32 %s212_s23, 4  ;;  %p160_p8 = scmp.ne.s32.totalorder %s266_s1, %s159_s27  ;;  %s28_s24 = int_to_ptr.vmem [resolvable:$true] %s27_s24 }
  0x15   :  { %p163_p9 = scmp.lt.u32.totalorder %s159_s27, %s266_s1 }
  0x17   :  { %p165_p10 = pnand %p163_p9, %p160_p8 }
  0x19   :  { %168 = shalt.err (!%p165_p10)
}
  0x1a   :  { %s169_s4 = scalar_lea.vmem %s28_s24, 256  ;;  %p174_p12 = scmp.lt.s32.totalorder %s28_s24, %s28_s24 }
  0x1b   :  { %p170_p11 = scmp.ne.s32.totalorder %s28_s24, %s169_s4  ;;  %p175_p13 = scmp.lt.s32.totalorder %s169_s4, %s169_s4 }
  0x1d   :  { %p176_p0 = por %p175_p13, %p174_p12 }
  0x1f   :  { %p177_p1 = pnand %p176_p0, %p170_p11 }
  0x21   :  { %180 = shalt.err (!%p177_p1)
}
  0x22   :  { %33 = dma.hbm_to_vmem [thread:$0]  %s266_s1, 256, %s28_s24, [#allocation6], %s210_s19, %s210_s19, %s211_s20  }
  0x23   :  { %203 = dma.done.wait [#allocation3], 256  }
  0x24   :  { %204 = vsyncadd [#allocation3], 4294967040 }
  0x25   :  { %205 = dma.done.wait [#allocation6], 256  }
  0x26   :  { %206 = vsyncadd [#allocation6], 4294967040  ;;  %v40_v0 = vld [vmem:[#allocation2] sm:$0xff]  ;;  %v41_v1 = vld [vmem:[#allocation2 + $0x8] sm:$0xff]  ;;  %s213_s1 = smov [#allocation7]  }
  0x27   :  { %v42_v2 = vld [vmem:[#allocation5] sm:$0xff]  ;;  %v43_v3 = vld [vmem:[#allocation5 + $0x8] sm:$0xff]  ;;  %v44_v4 = vand.u32 2147483647, %v40_v0  ;;  %v45_v5 = vand.u32 2147483647, %v41_v1 }
  0x28   :  { %v70_v6 = vmul.f32 2.0, %v42_v2  ;;  %v71_v7 = vmul.f32 2.0, %v43_v3  ;;  %v52_v29 = vmul.f32 %v42_v2, %v40_v0  ;;  %v56_v30 = vsub.f32 0.0, %v40_v0  ;;  %s106_s6 = sshll.u32 %s213_s1, 4  ;;  %s107_s6 = int_to_ptr.vmem [resolvable:$true] %s106_s6 }
  0x29   :  { %v46_v8 = vsub.f32 0.0, %v44_v4  ;;  %v47_v9 = vsub.f32 0.0, %v45_v5  ;;  %v53_v32 = vmul.f32 %v43_v3, %v41_v1  ;;  %v57_v33 = vsub.f32 0.0, %v41_v1  ;;  %s181_s7 = scalar_lea.vmem %s107_s6, 128  ;;  %p186_p3 = scmp.lt.s32.totalorder %s107_s6, %s107_s6 }
  0x2a   :  { %v72_v10 = vsub.f32 1.0, %v70_v6  ;;  %v73_v11 = vsub.f32 1.0, %v71_v7  ;;  %v54_v34 = vsub.f32 %v40_v0, %v52_v29  ;;  %v58_v35 = vmax.f32 %v56_v30, 0.0  ;;  %p182_p2 = scmp.ne.s32.totalorder %s107_s6, %s181_s7  ;;  %p187_p4 = scmp.lt.s32.totalorder %s181_s7, %s181_s7 }
  0x2b   :  { %v48_v12 = vmul.f32 1.442695, %v46_v8  ;;  %v50_v13 = vmul.f32 1.442695, %v47_v9  ;;  %v55_v37 = vsub.f32 %v41_v1, %v53_v32  ;;  %v59_v38 = vmax.f32 %v57_v33, 0.0 }
  0x2c   :  { %v74_v14 = vmul.f32 %v72_v10, %v40_v0  ;;  %v75_v15 = vmul.f32 %v73_v11, %v41_v1  ;;  %v60_v40 = vadd.f32 %v58_v35, %v54_v34  ;;  %p188_p5 = por %p187_p4, %p186_p3 }
  0x2d   :  { %121 = vpow2.f32 %v48_v12  ;;  %v61_v42 = vadd.f32 %v59_v38, %v55_v37 }
  0x2e   :  { %123 = vpow2.f32 %v50_v13  ;;  %v76_v16 = vand.u32 2147483647, %v74_v14  ;;  %v77_v17 = vand.u32 2147483647, %v75_v15  ;;  %vm84_vm0 = vcmp.ge.f32.partialorder %v74_v14, 0.0  ;;  %p189_p6 = pnand %p188_p5, %p182_p2 }
  0x2f   :  { %vm85_vm1 = vcmp.ge.f32.partialorder %v75_v15, 0.0 }
  0x30   :  { %v78_v18 = vsub.f32 0.0, %v76_v16  ;;  %v79_v19 = vsub.f32 0.0, %v77_v17 }
  0x32   :  { %v80_v20 = vmul.f32 1.442695, %v78_v18  ;;  %v82_v21 = vmul.f32 1.442695, %v79_v19 }
  0x34   :  { %125 = vpow2.f32 %v80_v20 }
  0x35   :  { %127 = vpow2.f32 %v82_v21 }
  0x37   :  { %v122_v22 = vpop.eup %121 }
  0x38   :  { %v124_v23 = vpop.eup %123  ;;  %v62_v24 = vadd.f32 1.0, %v122_v22 }
  0x39   :  { %v63_v25 = vadd.f32 1.0, %v124_v23 }
  0x3a   :  { %129 = vlog2.f32 %v62_v24 }
  0x3b   :  { %131 = vlog2.f32 %v63_v25 }
  0x3e   :  { %v126_v26 = vpop.eup %125 }
  0x3f   :  { %v128_v27 = vpop.eup %127  ;;  %v88_v28 = vadd.f32 1.0, %v126_v26  ;;  %v86_v44 = vsel %vm84_vm0, 1.0, %v126_v26 }
  0x40   :  { %v89_v31 = vadd.f32 1.0, %v128_v27  ;;  %v87_v45 = vsel %vm85_vm1, 1.0, %v128_v27 }
  0x41   :  { %133 = vrcp.f32 %v88_v28 }
  0x42   :  { %135 = vrcp.f32 %v89_v31 }
  0x44   :  { %v130_v36 = vpop.eup %129 }
  0x45   :  { %v132_v39 = vpop.eup %131  ;;  %v65_v41 = vmul.f32 0.6931472, %v130_v36 }
  0x46   :  { %v67_v43 = vmul.f32 0.6931472, %v132_v39 }
  0x47   :  { %v68_v48 = vadd.f32 %v65_v41, %v60_v40 }
  0x48   :  { %v69_v50 = vadd.f32 %v67_v43, %v61_v42 }
  0x4b   :  { %v134_v46 = vpop.eup %133 }
  0x4c   :  { %v136_v47 = vpop.eup %135  ;;  %v91_v49 = vmul.f32 %v134_v46, %v86_v44 }
  0x4d   :  { %v93_v51 = vmul.f32 %v136_v47, %v87_v45 }
  0x4e   :  { %v94_v52 = vmul.f32 %v91_v49, %v91_v49 }
  0x4f   :  { %v95_v53 = vmul.f32 %v93_v51, %v93_v51 }
  0x50   :  { %v96_v54 = vmul.f32 %v94_v52, %v68_v48 }
  0x51   :  { %v97_v55 = vmul.f32 %v95_v53, %v69_v50 }
  0x53   :  { %v98_v56 = vadd.f32 %v97_v55, %v96_v54 }
  0x55   :  { %99 = vst [vmem:[#allocation7] sm:$0xff] %v98_v56 }
  0x56   :  { %192 = shalt.err (!%p189_p6)
}
  0x57   :  { %s193_s10 = scalar_lea.hbm %s267_s2, 128 }
  0x58   :  { %p194_p7 = scmp.ne.s32.totalorder %s267_s2, %s193_s10  ;;  %p197_p8 = scmp.lt.u32.totalorder %s193_s10, %s267_s2 }
  0x5a   :  { %p199_p9 = pnand %p197_p8, %p194_p7 }
  0x5c   :  { %202 = shalt.err (!%p199_p9)
}
  0x5d   :  { %109 = dma.vmem_to_hbm [thread:$0]  %s107_s6, 128, %s267_s2, [#allocation4]  }
  0x5e   :  { %207 = dma.done.wait [#allocation4], 128  }
  0x5f   :  { %208 = vsyncadd [#allocation4], 4294967168 }
  0x60   :  { %113 = vsyncpa [#allocation3], 1 }
  0x61   :  { %114 = vsyncpa [#allocation6], 1 }
  0x62   :  { %115 = vsyncpa [#allocation4], 1 }

</bundles_post_ra>
